<compile_context>
chip_gen: v7x
topology: tpu7x:2x2x1
jax: 0.10.0
libtpu: 0.0.40
codegen_flags: <defaults>
</compile_context>

<pallas_src>
import jax
import jax.numpy as jnp
from jax.experimental import pallas as pl
from jax.experimental.pallas import tpu as pltpu

N_FEATURE = 21   # forward() hard-reshapes to (batch, 21)
N_HIDDEN = 64


def _mlp_kernel(x_ref, w1_ref, b1_ref, w2_ref, b2_ref, out_ref):
    # x tile streams from HBM in bf16 (half the bytes of f32); all math is f32.
    x = x_ref[...].astype(jnp.float32)
    h = jnp.dot(x, w1_ref[...], preferred_element_type=jnp.float32)
    h = jnp.maximum(h + b1_ref[...], 0.0)
    y = jnp.dot(h, w2_ref[...], preferred_element_type=jnp.float32)
    out_ref[...] = y + b2_ref[...]


def prepare_params(w1, b1, w2, b2):
    """Canonicalize params once (outside the hot path).

    w1: (21, 64), b1: (64,), w2: (64, n_output), b2: (n_output,)
    (weights stored (in, out), i.e. transposed vs PyTorch's (out, in)).
    No lane padding: each parameter block equals its full array shape and the
    weights stay VMEM-resident across grid steps (constant index_map).
    """
    w1 = jnp.asarray(w1, jnp.float32)
    b1 = jnp.reshape(jnp.asarray(b1, jnp.float32), (1, N_HIDDEN))
    w2 = jnp.asarray(w2, jnp.float32)
    b2 = jnp.reshape(jnp.asarray(b2, jnp.float32), (1, -1))
    return (w1, b1, w2, b2)


def _round_up(v, m):
    return -(-v // m) * m


def _choose_batch_tile(batch, tb_max, align=16):
    """Batch tile: multiple of `align` (bf16 sublane packing), adaptive size."""
    rb = max(align, _round_up(batch, align))          # batch rounded up
    tb = min(_round_up(tb_max, align), rb)
    # v7x has 2 TensorCores: give the "parallel" batch axis >= 2 grid steps
    # once the batch can feed both (one harmless extra step on 1-TC v5e/v6e).
    if rb >= 2 * align and pl.cdiv(rb, tb) < 2:
        tb = _round_up(pl.cdiv(rb, 2), align)
    # Cap tail-padding waste at ~10%, but never shrink below 256-row tiles so
    # the ~0.35us per-grid-step overhead stays amortized.
    while tb >= 512 and pl.cdiv(batch, tb) * tb > int(1.1 * batch) + align:
        tb = _round_up(tb // 2, align)
    return tb, pl.cdiv(batch, tb) * tb


def net_forward(x, params, *, tb=1024, min_pallas_batch=64, force_pallas=False):
    """Pallas equivalent of Net.forward. x: (batch, ...) reshaped to (batch, 21)."""
    w1, b1, w2, b2 = params
    n_output = w2.shape[1]
    batch = x.shape[0]
    x2d = jnp.reshape(x, (batch, N_FEATURE)).astype(jnp.float32)

    # Tiny batches are pure launch/fixed overhead for any custom call:
    # let plain XLA handle them unless the caller insists on the Pallas path.
    if batch < min_pallas_batch and not force_pallas:
        return jnp.maximum(x2d @ w1 + b1, 0.0) @ w2 + b2

    tb, padded_batch = _choose_batch_tile(batch, tb)

    # Stream x in bf16, padding the batch axis only (no lane padding: the
    # 21-wide last dim equals the full array dim, so each row costs 42 B of
    # HBM read instead of 512 B for a 128-lane f32 slab).
    xs = x2d.astype(jnp.bfloat16)
    if padded_batch != batch:
        xs = jnp.pad(xs, ((0, padded_batch - batch), (0, 0)))

    grid = (padded_batch // tb,)
    cost = pl.CostEstimate(
        flops=2 * padded_batch * (N_FEATURE * N_HIDDEN + N_HIDDEN * n_output),
        transcendentals=0,
        bytes_accessed=(2 * padded_batch * N_FEATURE            # bf16 x read
                        + 4 * padded_batch * n_output           # f32 out write
                        + 4 * (N_FEATURE * N_HIDDEN + N_HIDDEN  # resident params
                               + N_HIDDEN * n_output + n_output)),
    )

    out = pl.pallas_call(
        _mlp_kernel,
        out_shape=jax.ShapeDtypeStruct((padded_batch, n_output), jnp.float32),
        grid=grid,
        in_specs=[
            pl.BlockSpec((tb, N_FEATURE), lambda i: (i, 0)),        # x: batch-tiled
            pl.BlockSpec((N_FEATURE, N_HIDDEN), lambda i: (0, 0)),  # w1: resident
            pl.BlockSpec((1, N_HIDDEN), lambda i: (0, 0)),          # b1: resident
            pl.BlockSpec((N_HIDDEN, n_output), lambda i: (0, 0)),   # w2: resident
            pl.BlockSpec((1, n_output), lambda i: (0, 0)),          # b2: resident
        ],
        out_specs=pl.BlockSpec((tb, n_output), lambda i: (i, 0)),
        compiler_params=pltpu.CompilerParams(
            dimension_semantics=("parallel",),
        ),
        cost_estimate=cost,
    )(xs, w1, b1, w2, b2)

    # Strip batch padding; output lanes are already exactly n_output wide.
    return out[:batch]


def init_params(key, n_feature=N_FEATURE, n_hidden=N_HIDDEN, n_output=4):
    """Weights ~ Normal(0, 0.1) (matching .normal_(0, 0.1)); biases zero."""
    k1, k2 = jax.random.split(key)
    # PyTorch stores Linear weight as (out, in); we store transposed (in, out).
    w1 = 0.1 * jax.random.normal(k1, (n_feature, n_hidden), dtype=jnp.float32)
    b1 = jnp.zeros((n_hidden,), dtype=jnp.float32)
    w2 = 0.1 * jax.random.normal(k2, (n_hidden, n_output), dtype=jnp.float32)
    b2 = jnp.zeros((n_output,), dtype=jnp.float32)
    return w1, b1, w2, b2


if __name__ == "__main__":
    key = jax.random.PRNGKey(0)
    kx, kp, kb = jax.random.split(key, 3)

    n_output = 4
    w1, b1, w2, b2 = init_params(kp, n_output=n_output)
    params = prepare_params(w1, b1, w2, b2)

    def ref_forward(xr):
        xr = jnp.reshape(xr, (xr.shape[0], N_FEATURE)).astype(jnp.float32)
        return jnp.maximum(xr @ w1 + b1, 0.0) @ w2 + b2

    # Small-shape check (batch=2; force the Pallas path so the kernel runs).
    x_small = jax.random.normal(kx, (2, N_FEATURE), dtype=jnp.float32)
    out_small = net_forward(x_small, params, force_pallas=True)
    jax.block_until_ready(out_small)
    assert out_small.shape == (2, n_output)
    assert jnp.allclose(out_small, ref_forward(x_small), atol=2e-2, rtol=2e-2)

    # Larger batch exercises the multi-step grid + batch-tail padding path.
    x_big = jax.random.normal(kb, (200, N_FEATURE), dtype=jnp.float32)
    out_big = net_forward(x_big, params, force_pallas=True)
    jax.block_until_ready(out_big)
    assert out_big.shape == (200, n_output)
    assert jnp.allclose(out_big, ref_forward(x_big), atol=2e-2, rtol=2e-2)

    print("KERNEL_OK")
</pallas_src>

<mosaic_0001>
module attributes {stable_mosaic.version = 11 : i64} {
  func.func @_mlp_kernel(%arg0: i32, %arg1: memref<16x21xbf16, #tpu.memory_space<vmem>>, %arg2: memref<21x64xf32, #tpu.memory_space<vmem>>, %arg3: memref<1x64xf32, #tpu.memory_space<vmem>>, %arg4: memref<64x4xf32, #tpu.memory_space<vmem>>, %arg5: memref<1x4xf32, #tpu.memory_space<vmem>>, %arg6: memref<16x4xf32, #tpu.memory_space<vmem>>) attributes {dimension_semantics = [#tpu.dimension_semantics<parallel>], iteration_bounds = array<i64: 1>, scalar_prefetch = 0 : i64, scratch_operands = 0 : i64, tpu.core_type = #tpu.core_type<tc>, window_params = [{transform_indices = @transform_0, window_bounds = array<i64: 16, 21>}, {pipeline_mode = #tpu.pipeline_mode<synchronous>, transform_indices = @transform_1, window_bounds = array<i64: 21, 64>}, {pipeline_mode = #tpu.pipeline_mode<synchronous>, transform_indices = @transform_2, window_bounds = array<i64: 1, 64>}, {pipeline_mode = #tpu.pipeline_mode<synchronous>, transform_indices = @transform_3, window_bounds = array<i64: 64, 4>}, {pipeline_mode = #tpu.pipeline_mode<synchronous>, transform_indices = @transform_4, window_bounds = array<i64: 1, 4>}, {transform_indices = @transform_5, window_bounds = array<i64: 16, 4>}]} {
    %c0 = arith.constant 0 : index
    %c0_0 = arith.constant 0 : index
    %0 = vector.load %arg1[%c0, %c0_0] : memref<16x21xbf16, #tpu.memory_space<vmem>>, vector<16x21xbf16>
    %1 = arith.extf %0 : vector<16x21xbf16> to vector<16x21xf32>
    %c0_1 = arith.constant 0 : index
    %c0_2 = arith.constant 0 : index
    %2 = vector.load %arg2[%c0_1, %c0_2] : memref<21x64xf32, #tpu.memory_space<vmem>>, vector<21x64xf32>
    %cst = arith.constant dense<0.000000e+00> : vector<16x64xf32>
    %3 = tpu.matmul %1, %2, %cst {dimension_numbers = #tpu.dot_dimension_numbers<[1], [0], [0], [1], [0, 0, 1, 1], [], []>} : vector<16x21xf32>, vector<21x64xf32>, vector<16x64xf32> -> vector<16x64xf32>
    %c0_3 = arith.constant 0 : index
    %c0_4 = arith.constant 0 : index
    %4 = vector.load %arg3[%c0_3, %c0_4] : memref<1x64xf32, #tpu.memory_space<vmem>>, vector<1x64xf32>
    %5 = vector.broadcast %4 : vector<1x64xf32> to vector<16x64xf32>
    %6 = arith.addf %3, %5 : vector<16x64xf32>
    %cst_5 = arith.constant 0.000000e+00 : f32
    %7 = vector.broadcast %cst_5 : f32 to vector<16x64xf32>
    %8 = arith.maximumf %6, %7 : vector<16x64xf32>
    %c0_6 = arith.constant 0 : index
    %c0_7 = arith.constant 0 : index
    %9 = vector.load %arg4[%c0_6, %c0_7] : memref<64x4xf32, #tpu.memory_space<vmem>>, vector<64x4xf32>
    %cst_8 = arith.constant dense<0.000000e+00> : vector<16x4xf32>
    %10 = tpu.matmul %8, %9, %cst_8 {dimension_numbers = #tpu.dot_dimension_numbers<[1], [0], [0], [1], [0, 0, 1, 1], [], []>} : vector<16x64xf32>, vector<64x4xf32>, vector<16x4xf32> -> vector<16x4xf32>
    %c0_9 = arith.constant 0 : index
    %c0_10 = arith.constant 0 : index
    %11 = vector.load %arg5[%c0_9, %c0_10] : memref<1x4xf32, #tpu.memory_space<vmem>>, vector<1x4xf32>
    %12 = vector.broadcast %11 : vector<1x4xf32> to vector<16x4xf32>
    %13 = arith.addf %10, %12 : vector<16x4xf32>
    %c0_11 = arith.constant 0 : index
    %c0_12 = arith.constant 0 : index
    %14 = vector.load %arg6[%c0_11, %c0_12] : memref<16x4xf32, #tpu.memory_space<vmem>>, vector<16x4xf32>
    tpu.vector_store %arg6[%c0_11, %c0_12], %13 {strides = array<i32>} : memref<16x4xf32, #tpu.memory_space<vmem>>, vector<16x4xf32>,
    return
  }
  func.func @transform_0(%arg0: i32) -> (i32, i32) {
    %c0_i32 = arith.constant 0 : i32
    %c0_i32_0 = arith.constant 0 : i32
    return %arg0, %c0_i32 : i32, i32
  }
  func.func @transform_1(%arg0: i32) -> (i32, i32) {
    %c0_i32 = arith.constant 0 : i32
    %c0_i32_0 = arith.constant 0 : i32
    %c0_i32_1 = arith.constant 0 : i32
    return %c0_i32, %c0_i32_0 : i32, i32
  }
  func.func @transform_2(%arg0: i32) -> (i32, i32) {
    %c0_i32 = arith.constant 0 : i32
    %c0_i32_0 = arith.constant 0 : i32
    %c0_i32_1 = arith.constant 0 : i32
    return %c0_i32, %c0_i32_0 : i32, i32
  }
  func.func @transform_3(%arg0: i32) -> (i32, i32) {
    %c0_i32 = arith.constant 0 : i32
    %c0_i32_0 = arith.constant 0 : i32
    %c0_i32_1 = arith.constant 0 : i32
    return %c0_i32, %c0_i32_0 : i32, i32
  }
  func.func @transform_4(%arg0: i32) -> (i32, i32) {
    %c0_i32 = arith.constant 0 : i32
    %c0_i32_0 = arith.constant 0 : i32
    %c0_i32_1 = arith.constant 0 : i32
    return %c0_i32, %c0_i32_0 : i32, i32
  }
  func.func @transform_5(%arg0: i32) -> (i32, i32) {
    %c0_i32 = arith.constant 0 : i32
    %c0_i32_0 = arith.constant 0 : i32
    return %arg0, %c0_i32 : i32, i32
  }
}

</mosaic_0001>

<bundles_post_ra>
// kernel: tpu_custom_call.1
= control target key start
LH: loop header
LB: loop body
LE: loop exit
PB: predicated region body
PF: predicated region fallthrough
CT: control target
= control target key end

     0   :  { %vm34_vm0 = vcmask 171008   ;;  %vm41_vm1 = vcmask 1044480   ;;  %vm137_vm2 = vcmask 523264   ;;  %vm219_vm3 = vcmask 31744   ;;  %s382_s1 = inlined_call_operand.vmem [shape: f32[21,64], index: 1, kind: input, shape index: {}]   ;;  %s383_s0 = inlined_call_operand.vmem [shape: bf16[16,21], index: 0, kind: input, shape index: {}]   ;;  %s384_s3 = inlined_call_operand.vmem [shape: f32[64,4], index: 3, kind: input, shape index: {}]   ;;  %s385_s2 = inlined_call_operand.vmem [shape: f32[1,64], index: 2, kind: input, shape index: {}]   ;;  %s386_s4 = inlined_call_operand.vmem [shape: f32[1,4], index: 4, kind: input, shape index: {}]   ;;  %s387_s5 = inlined_call_operand.vmem [shape: f32[16,4], index: 5, kind: output, shape index: {}]  }
   0x1   :  { %v24_v0 = vld [vmem:[%s382_s1] sm:$0xff]  ;;  %v25_v1 = vld [vmem:[%s382_s1 + $0x8] sm:$0xff]  ;;  %v26_v6 = vld [vmem:[%s382_s1 + $0x10] sm:$0x1f] }
   0x2   :  { %v280_v2 = vpack.c.bf16 %v25_v1, %v24_v0  ;;  %v234_v3 = vld [vmem:[%s383_s0] sm:$0xff]   ;;  %v123_v5 = vld [vmem:[%s384_s3 + $0x8] sm:$0xff]  ;;  %v124_v9 = vld [vmem:[%s384_s3 + $0x10] sm:$0xff] }
   0x3   :  { %v122_v4 = vld [vmem:[%s384_s3] sm:$0xff]  ;;  %v235_v7 = vunpack.c.l.bf16 %v234_v3  ;;  %v125_v10 = vld [vmem:[%s384_s3 + $0x18] sm:$0xff]  ;;  %v127_v13 = vld [vmem:[%s384_s3 + $0x28] sm:$0xff]  ;;  %v236_v14 = vunpack.c.h.bf16 %v234_v3 }
   0x4   :  { %v284_v8 = vpack.c.bf16 %v123_v5, %v122_v4  ;;  %281 = vmatprep.subr.bf16.mxu0 %v280_v2  ;;  %v288_v11 = vpack.c.bf16 %v125_v10, %v124_v9  ;;  %v126_v12 = vld [vmem:[%s384_s3 + $0x20] sm:$0xff]  ;;  %v128_v16 = vld [vmem:[%s384_s3 + $0x30] sm:$0xff]  ;;  %v129_v17 = vld [vmem:[%s384_s3 + $0x38] sm:$0xff] }
   0x5   :  { %283 = vmatpush3.bf16.msra.mxu0 %v280_v2  ;;  %258 = vmatprep.mubr.msk.f32.mxu0 %vm34_vm0, %v235_v7  ;;  %v292_v15 = vpack.c.bf16 %v127_v13, %v126_v12  ;;  %v296_v18 = vpack.c.bf16 %v129_v17, %v128_v16  ;;  %v226_v19 = vld [vmem:[%s385_s2] ss:$0 sm:$0xff] }
   0x6   :  { %256 = vmatprep.subr.msk.mxu0 %vm41_vm1, %v26_v6  ;;  %285 = vmatprep.subr.bf16.mxu1 %v284_v8  ;;  %v230_v26 = vld [vmem:[%s386_s4] ss:$0 sm:$0xff] }
   0x7   :  { %287 = vmatpush3.bf16.msra.mxu1 %v284_v8 }
   0x8   :  { %289 = vmatprep.subr.bf16.mxu1 %v288_v11 }
   0x9   :  { %257 = vmatpush3.msk.msra.mxu0 %vm41_vm1, %v26_v6 }
   0xa   :  { %259 = vmatmul.mubr.msk.f32.vlgmr.msra.gmra.mrb[0].mxu0 %vm34_vm0, %v236_v14 }
   0xb   :  { %291 = vmatpush3.bf16.msra.mxu1 %v288_v11 }
   0xc   :  { %293 = vmatprep.subr.bf16.mxu1 %v292_v15 }
   0xf   :  { %295 = vmatpush3.bf16.msra.mxu1 %v292_v15 }
  0x10   :  { %297 = vmatprep.subr.bf16.mxu1 %v296_v18 }
  0x13   :  { %299 = vmatpush3.bf16.msra.mxu1 %v296_v18 }
  0xdd   :  { %v260_v20 = vpop.f32.mrb[0].mxu0 }
  0xde   :  { %v117_v21 = vadd.f32 %v260_v20, %v226_v19  ;;  %v111_v22 = vpop.f32.mrb[1].mxu0 }
  0xdf   :  { %v112_v23 = vadd.f32 %v226_v19, %v111_v22 }
  0xe0   :  { %v121_v25 = vmax.f32 %v117_v21, 0.0 }
  0xe1   :  { %v120_v24 = vmax.f32 %v112_v23, 0.0 }
  0xe3   :  { %277 = vmatprep.mubr.msk.f32.mxu1 %vm137_vm2, %v120_v24 }
  0xe4   :  { %278 = vmatmul.mubr.msk.f32.vlgmr.msra.gmra.mrb[0].mxu1 %vm137_vm2, %v121_v25 }
 0x1b7   :  { %v279_v27 = vpop.f32.mrb[0].mxu1 }
 0x1b8   :  { %v216_v28 = vadd.f32 %v279_v27, %v230_v26  ;;  %v210_v29 = vpop.f32.mrb[1].mxu1 }
 0x1b9   :  { %v211_v30 = vadd.f32 %v230_v26, %v210_v29 }
 0x1ba   :  { %221 = vst.msk [vmem:[%s387_s5 + $0x8] sm:$0xff] %vm219_vm3, %v216_v28 }
 0x1bb   :  { %220 = vst.msk [vmem:[%s387_s5] sm:$0xff] %vm219_vm3, %v211_v30 }

</bundles_post_ra>
